<compile_context>
chip_gen: v7x
topology: tpu7x:2x2x1
jax: 0.10.0
libtpu: 0.0.40
codegen_flags: <defaults>
</compile_context>

<pallas_src>
import math

import jax
import jax.numpy as jnp
from jax.experimental import pallas as pl
from jax.experimental.pallas import tpu as pltpu


def _patch_embed_kernel(x_ref, w_ref, pe_ref, o_ref):
    # x_ref : (TM, Pg)  compute dtype (bf16)
    # w_ref : (Pg, Dg)  compute dtype (bf16), constant across the grid
    # pe_ref: (TM, Dg)  f32, constant across the grid
    # o_ref : (TM, Dg)
    proj = jnp.dot(x_ref[...], w_ref[...], preferred_element_type=jnp.float32)
    o_ref[...] = (proj + pe_ref[...]).astype(o_ref.dtype)


def _choose_tile_m(m, period, target):
    """Row-tile size: a multiple of `period` (so one resident positional tile is
    valid for every block), a multiple of 8 (sublane) unless it covers all rows,
    and roughly `target` rows."""
    if m <= target:
        return m
    k = max(1, target // period)
    tm = k * period
    while tm % 8 != 0 and tm > period:
        tm -= period
    if tm % 8 != 0:
        return m  # cannot align; fall back to a single full-size block
    return tm


def make_positional_embedding(n, d_model, dtype=jnp.float32):
    """Replicates PositionalEmbedding.pe[0, :n, :] (even d_model, as in PyTorch)."""
    if d_model % 2 != 0:
        raise ValueError("PositionalEmbedding requires an even d_model "
                         "(the PyTorch reference assumes this too).")
    position = jnp.arange(n, dtype=jnp.float32)[:, None]                    # (n, 1)
    div_term = jnp.exp(jnp.arange(0, d_model, 2, dtype=jnp.float32)
                       * (-math.log(10000.0) / d_model))                    # (d/2,)
    angles = position * div_term                                            # (n, d/2)
    pe = jnp.zeros((n, d_model), jnp.float32)
    pe = pe.at[:, 0::2].set(jnp.sin(angles))
    pe = pe.at[:, 1::2].set(jnp.cos(angles))
    return pe.astype(dtype)


def patch_embedding_ds(x, weight_t, pe, *, target_tile_rows=512,
                       compute_dtype=jnp.bfloat16, out_dtype=None):
    """x: (B, N, P); weight_t: (P, D) == value_embedding.weight.T; pe: (N, D).

    Returns (B, N, D) == dropout(x @ W + pe) with eval-mode (identity) dropout.
    """
    B, N, P = x.shape
    Pw, D = weight_t.shape
    if Pw != P:
        raise ValueError("weight_t must have shape (patch_len, d_model)")
    if pe.shape != (N, D):
        raise ValueError("pe must have shape (num_patches, d_model)")
    if out_dtype is None:
        out_dtype = x.dtype

    M = B * N

    # ---- lane-dense grouping -------------------------------------------------
    group = 1
    if D < 128 and 128 % D == 0 and N % (128 // D) == 0:
        group = 128 // D
    Pg, Dg = P * group, D * group
    Ng, Mg = N // group, M // group

    x_g = x.reshape(Mg, Pg).astype(compute_dtype)
    if group == 1:
        w_g = weight_t.astype(compute_dtype)
    else:
        w_g = jax.scipy.linalg.block_diag(*([weight_t] * group)).astype(compute_dtype)
    pe_g = pe.reshape(Ng, Dg).astype(jnp.float32)

    # ---- tiling over the flattened row axis ----------------------------------
    tm = _choose_tile_m(Mg, Ng, target_tile_rows)
    # One positional tile reused by every grid step (valid because tm % Ng == 0,
    # so every block starts at a positional-period boundary).
    pe_tile = jnp.tile(pe_g, (tm // Ng, 1))          # (tm, Dg)
    grid_m = pl.cdiv(Mg, tm)

    itemsize_in = jnp.dtype(compute_dtype).itemsize
    itemsize_out = jnp.dtype(out_dtype).itemsize

    cparams = dict(dimension_semantics=("parallel",))
    # Double-buffered x/out tiles + resident weight/pe; raise the scoped-VMEM
    # limit only when actually needed (cap below v7x's 64 MiB physical VMEM).
    vmem_est = (2 * tm * (Pg * itemsize_in + Dg * itemsize_out)
                + Pg * Dg * itemsize_in + tm * Dg * 4)
    if vmem_est > 24 * 1024 * 1024:
        cparams["vmem_limit_bytes"] = int(min(2 * vmem_est, 56 * 1024 * 1024))

    cost = pl.CostEstimate(
        flops=2 * grid_m * tm * Pg * Dg,
        transcendentals=0,
        bytes_accessed=(Mg * Pg * itemsize_in + Pg * Dg * itemsize_in
                        + tm * Dg * 4 + Mg * Dg * itemsize_out),
    )

    def build(single_buffer_constants):
        const_kw = (dict(pipeline_mode=pl.Buffered(1))
                    if single_buffer_constants else {})
        return pl.pallas_call(
            _patch_embed_kernel,
            out_shape=jax.ShapeDtypeStruct((Mg, Dg), out_dtype),
            grid=(grid_m,),
            in_specs=[
                pl.BlockSpec((tm, Pg), lambda i: (i, 0)),
                pl.BlockSpec((Pg, Dg), lambda i: (0, 0), **const_kw),
                pl.BlockSpec((tm, Dg), lambda i: (0, 0), **const_kw),
            ],
            out_specs=pl.BlockSpec((tm, Dg), lambda i: (i, 0)),
            compiler_params=pltpu.CompilerParams(**cparams),
            cost_estimate=cost,
        )

    try:
        out_g = build(True)(x_g, w_g, pe_tile)
        out_g = jax.block_until_ready(out_g)
    except Exception:
        # Fallback if this runtime rejects single-buffered pipeline_mode.
        out_g = build(False)(x_g, w_g, pe_tile)

    return out_g.reshape(B, N, D)


if __name__ == "__main__":
    # Small shapes consistent with the module's forward:
    # x: (batch=2, num_patches=8, patch_len=16), d_model=32
    B, N, P, D = 2, 8, 16, 32

    key = jax.random.PRNGKey(0)
    kx, kw = jax.random.split(key)

    x = jax.random.normal(kx, (B, N, P), dtype=jnp.float32)

    # nn.Linear(patch_len, d_model, bias=False) init: U(-1/sqrt(P), 1/sqrt(P));
    # stored as (P, D) = weight.T so the kernel computes x @ W.
    bound = 1.0 / math.sqrt(P)
    weight_t = jax.random.uniform(kw, (P, D), minval=-bound, maxval=bound,
                                  dtype=jnp.float32)

    pe = make_positional_embedding(N, D)

    out = patch_embedding_ds(x, weight_t, pe)
    out = jax.block_until_ready(out)

    # Reference (eval-mode dropout is identity).  The kernel feeds the MXU in
    # bf16, so compare against f32 math on bf16-rounded inputs.
    xr = x.astype(jnp.bfloat16).astype(jnp.float32)
    wr = weight_t.astype(jnp.bfloat16).astype(jnp.float32)
    ref = jnp.einsum("bnp,pd->bnd", xr, wr) + pe[None, :, :]

    assert out.shape == (B, N, D)
    assert jnp.allclose(out, ref, atol=1e-2, rtol=1e-2), \
        float(jnp.max(jnp.abs(out - ref)))

    print("KERNEL_OK")
</pallas_src>

<mosaic_0001>
module attributes {stable_mosaic.version = 11 : i64} {
  func.func @_patch_embed_kernel(%arg0: i32, %arg1: memref<4x64xbf16, #tpu.memory_space<vmem>>, %arg2: memref<64x128xbf16, #tpu.memory_space<vmem>>, %arg3: memref<4x128xf32, #tpu.memory_space<vmem>>, %arg4: memref<4x128xf32, #tpu.memory_space<vmem>>) attributes {dimension_semantics = [#tpu.dimension_semantics<parallel>], iteration_bounds = array<i64: 1>, scalar_prefetch = 0 : i64, scratch_operands = 0 : i64, tpu.core_type = #tpu.core_type<tc>, window_params = [{transform_indices = @transform_0, window_bounds = array<i64: 4, 64>}, {pipeline_mode = #tpu.pipeline_mode<synchronous>, transform_indices = @transform_1, window_bounds = array<i64: 64, 128>}, {pipeline_mode = #tpu.pipeline_mode<synchronous>, transform_indices = @transform_2, window_bounds = array<i64: 4, 128>}, {transform_indices = @transform_3, window_bounds = array<i64: 4, 128>}]} {
    %c0 = arith.constant 0 : index
    %c0_0 = arith.constant 0 : index
    %0 = vector.load %arg1[%c0, %c0_0] : memref<4x64xbf16, #tpu.memory_space<vmem>>, vector<4x64xbf16>
    %c0_1 = arith.constant 0 : index
    %c0_2 = arith.constant 0 : index
    %1 = vector.load %arg2[%c0_1, %c0_2] : memref<64x128xbf16, #tpu.memory_space<vmem>>, vector<64x128xbf16>
    %cst = arith.constant dense<0.000000e+00> : vector<4x128xf32>
    %2 = tpu.matmul %0, %1, %cst {dimension_numbers = #tpu.dot_dimension_numbers<[1], [0], [0], [1], [0, 0, 1, 1], [], []>} : vector<4x64xbf16>, vector<64x128xbf16>, vector<4x128xf32> -> vector<4x128xf32>
    %c0_3 = arith.constant 0 : index
    %c0_4 = arith.constant 0 : index
    %3 = vector.load %arg3[%c0_3, %c0_4] : memref<4x128xf32, #tpu.memory_space<vmem>>, vector<4x128xf32>
    %4 = arith.addf %2, %3 : vector<4x128xf32>
    %c0_5 = arith.constant 0 : index
    %c0_6 = arith.constant 0 : index
    %5 = vector.load %arg4[%c0_5, %c0_6] : memref<4x128xf32, #tpu.memory_space<vmem>>, vector<4x128xf32>
    tpu.vector_store %arg4[%c0_5, %c0_6], %4 {strides = array<i32>} : memref<4x128xf32, #tpu.memory_space<vmem>>, vector<4x128xf32>,
    return
  }
  func.func @transform_0(%arg0: i32) -> (i32, i32) {
    %c0_i32 = arith.constant 0 : i32
    %c0_i32_0 = arith.constant 0 : i32
    return %arg0, %c0_i32 : i32, i32
  }
  func.func @transform_1(%arg0: i32) -> (i32, i32) {
    %c0_i32 = arith.constant 0 : i32
    %c0_i32_0 = arith.constant 0 : i32
    %c0_i32_1 = arith.constant 0 : i32
    return %c0_i32, %c0_i32_0 : i32, i32
  }
  func.func @transform_2(%arg0: i32) -> (i32, i32) {
    %c0_i32 = arith.constant 0 : i32
    %c0_i32_0 = arith.constant 0 : i32
    %c0_i32_1 = arith.constant 0 : i32
    return %c0_i32, %c0_i32_0 : i32, i32
  }
  func.func @transform_3(%arg0: i32) -> (i32, i32) {
    %c0_i32 = arith.constant 0 : i32
    %c0_i32_0 = arith.constant 0 : i32
    return %arg0, %c0_i32 : i32, i32
  }
}

module attributes {stable_mosaic.version = 11 : i64} {
  func.func @_patch_embed_kernel(%arg0: i32, %arg1: memref<4x64xbf16, #tpu.memory_space<vmem>>, %arg2: memref<64x128xbf16, #tpu.memory_space<vmem>>, %arg3: memref<4x128xf32, #tpu.memory_space<vmem>>, %arg4: memref<4x128xf32, #tpu.memory_space<vmem>>) attributes {dimension_semantics = [#tpu.dimension_semantics<parallel>], iteration_bounds = array<i64: 1>, scalar_prefetch = 0 : i64, scratch_operands = 0 : i64, tpu.core_type = #tpu.core_type<tc>, window_params = [{transform_indices = @transform_0, window_bounds = array<i64: 4, 64>}, {pipeline_mode = #tpu.pipeline_mode<synchronous>, transform_indices = @transform_1, window_bounds = array<i64: 64, 128>}, {pipeline_mode = #tpu.pipeline_mode<synchronous>, transform_indices = @transform_2, window_bounds = array<i64: 4, 128>}, {transform_indices = @transform_3, window_bounds = array<i64: 4, 128>}]} {
    %c0 = arith.constant 0 : index
    %c0_0 = arith.constant 0 : index
    %0 = vector.load %arg1[%c0, %c0_0] : memref<4x64xbf16, #tpu.memory_space<vmem>>, vector<4x64xbf16>
    %c0_1 = arith.constant 0 : index
    %c0_2 = arith.constant 0 : index
    %1 = vector.load %arg2[%c0_1, %c0_2] : memref<64x128xbf16, #tpu.memory_space<vmem>>, vector<64x128xbf16>
    %cst = arith.constant dense<0.000000e+00> : vector<4x128xf32>
    %2 = tpu.matmul %0, %1, %cst {dimension_numbers = #tpu.dot_dimension_numbers<[1], [0], [0], [1], [0, 0, 1, 1], [], []>} : vector<4x64xbf16>, vector<64x128xbf16>, vector<4x128xf32> -> vector<4x128xf32>
    %c0_3 = arith.constant 0 : index
    %c0_4 = arith.constant 0 : index
    %3 = vector.load %arg3[%c0_3, %c0_4] : memref<4x128xf32, #tpu.memory_space<vmem>>, vector<4x128xf32>
    %4 = arith.addf %2, %3 : vector<4x128xf32>
    %c0_5 = arith.constant 0 : index
    %c0_6 = arith.constant 0 : index
    %5 = vector.load %arg4[%c0_5, %c0_6] : memref<4x128xf32, #tpu.memory_space<vmem>>, vector<4x128xf32>
    tpu.vector_store %arg4[%c0_5, %c0_6], %4 {strides = array<i32>} : memref<4x128xf32, #tpu.memory_space<vmem>>, vector<4x128xf32>,
    return
  }
  func.func @transform_0(%arg0: i32) -> (i32, i32) {
    %c0_i32 = arith.constant 0 : i32
    %c0_i32_0 = arith.constant 0 : i32
    return %arg0, %c0_i32 : i32, i32
  }
  func.func @transform_1(%arg0: i32) -> (i32, i32) {
    %c0_i32 = arith.constant 0 : i32
    %c0_i32_0 = arith.constant 0 : i32
    %c0_i32_1 = arith.constant 0 : i32
    return %c0_i32, %c0_i32_0 : i32, i32
  }
  func.func @transform_2(%arg0: i32) -> (i32, i32) {
    %c0_i32 = arith.constant 0 : i32
    %c0_i32_0 = arith.constant 0 : i32
    %c0_i32_1 = arith.constant 0 : i32
    return %c0_i32, %c0_i32_0 : i32, i32
  }
  func.func @transform_3(%arg0: i32) -> (i32, i32) {
    %c0_i32 = arith.constant 0 : i32
    %c0_i32_0 = arith.constant 0 : i32
    return %arg0, %c0_i32 : i32, i32
  }
}

</mosaic_0001>

<bundles_post_ra>
// kernel: tpu_custom_call.1
= control target key start
LH: loop header
LB: loop body
LE: loop exit
PB: predicated region body
PF: predicated region fallthrough
CT: control target
= control target key end

     0   :  { %8 = vsyncpa [#allocation3], 0  ;;  %s315_s0 = inlined_call_operand.hbm [shape: bf16[4,64], index: 0, kind: input, shape index: {}]   ;;  %s316_s1 = inlined_call_operand.hbm [shape: bf16[64,128], index: 1, kind: input, shape index: {}]   ;;  %s317_s2 = inlined_call_operand.vmem [shape: f32[4,128], index: 2, kind: input, shape index: {}]   ;;  %s318_s3 = inlined_call_operand.hbm [shape: f32[4,128], index: 3, kind: output, shape index: {}]  }
   0x1   :  { %9 = vsyncpa [#allocation6], 0 }
   0x2   :  { %10 = vsyncpa [#allocation4], 0  ;;  %s242_s12 = smov [#allocation2]   ;;  %s243_s14 = smov [#allocation5]  }
   0x3   :  { %s17_s13 = sshll.u32 %s242_s12, 4  ;;  %s26_s15 = sshll.u32 %s243_s14, 4  ;;  %s18_s13 = int_to_ptr.vmem [resolvable:$true] %s17_s13  ;;  %s269_s15 = int_to_ptr.vmem [resolvable:$true] %s26_s15 }
   0x4   :  { %s170_s18 = scalar_lea.hbm %s315_s0, 32 }
   0x5   :  { %p171_p0 = scmp.ne.s32.totalorder %s315_s0, %s170_s18  ;;  %p174_p1 = scmp.lt.u32.totalorder %s170_s18, %s315_s0 }
   0x7   :  { %p176_p2 = pnand %p174_p1, %p171_p0 }
   0x9   :  { %179 = shalt.err (!%p176_p2)
}
   0xa   :  { %s180_s23 = scalar_lea.vmem %s18_s13, 32  ;;  %p185_p4 = scmp.lt.s32.totalorder %s18_s13, %s18_s13 }
   0xb   :  { %p181_p3 = scmp.ne.s32.totalorder %s18_s13, %s180_s23  ;;  %p186_p5 = scmp.lt.s32.totalorder %s180_s23, %s180_s23 }
   0xd   :  { %p187_p6 = por %p186_p5, %p185_p4 }
   0xf   :  { %p188_p7 = pnand %p187_p6, %p181_p3 }
  0x11   :  { %191 = shalt.err (!%p188_p7)
}
  0x12   :  { %20 = dma.hbm_to_vmem [thread:$0]  %s315_s0, 32, %s18_s13, [#allocation3]  }
  0x13   :  { %s192_s28 = scalar_lea.hbm %s316_s1, 512 }
  0x14   :  { %p193_p8 = scmp.ne.s32.totalorder %s316_s1, %s192_s28  ;;  %p196_p9 = scmp.lt.u32.totalorder %s192_s28, %s316_s1 }
  0x16   :  { %p198_p10 = pnand %p196_p9, %p193_p8 }
  0x18   :  { %201 = shalt.err (!%p198_p10)
}
  0x19   :  { %s202_s6 = scalar_lea.vmem %s269_s15, 512  ;;  %p207_p12 = scmp.lt.s32.totalorder %s269_s15, %s269_s15 }
  0x1a   :  { %p203_p11 = scmp.ne.s32.totalorder %s269_s15, %s202_s6  ;;  %p208_p13 = scmp.lt.s32.totalorder %s202_s6, %s202_s6 }
  0x1c   :  { %p209_p0 = por %p208_p13, %p207_p12 }
  0x1e   :  { %p210_p1 = pnand %p209_p0, %p203_p11 }
  0x20   :  { %213 = shalt.err (!%p210_p1)
}
  0x21   :  { %s244_s0 = smov 64   ;;  %s245_s7 = smov 4  }
  0x22   :  { %32 = dma.hbm_to_vmem [thread:$0]  %s316_s1, 512, %s269_s15, [#allocation6], %s244_s0, %s244_s0, %s245_s7  }
  0x23   :  { %236 = dma.done.wait [#allocation3], 32  }
  0x24   :  { %237 = vsyncadd [#allocation3], 4294967264 }
  0x25   :  { %238 = dma.done.wait [#allocation6], 512  }
  0x26   :  { %239 = vsyncadd [#allocation6], 4294966784  ;;  %v246_v0 = vmov 0.0   ;;  %vm247_vm0 = vmmov 0   ;;  %v166_v1 = vld [vmem:[#allocation5] sm:$0xff]   ;;  %v167_v2 = vld [vmem:[#allocation5 + $0x8] sm:$0xff]  }
  0x27   :  { %147 = vmatprep.subr.bf16.mxu0 %v246_v0  ;;  %155 = vmatprep.mubr.msk.bf16.mxu0 %vm247_vm0, %v246_v0  ;;  %v168_v3 = vld [vmem:[#allocation5 + $0x10] sm:$0xff]   ;;  %v169_v4 = vld [vmem:[#allocation5 + $0x18] sm:$0xff]   ;;  %vm76_vm1 = vcmask 523264   ;;  %s248_s11 = smov [#allocation7]  }
  0x28   :  { %148 = vmatpush3.bf16.msra.mxu0 %v166_v1  ;;  %v42_v5 = vld [vmem:[#allocation2] sm:$0x3]  ;;  %v51_v6 = vld [vmem:[%s317_s2] sm:$0xf]  ;;  %s127_s12 = sshll.u32 %s248_s11, 4  ;;  %s128_s12 = int_to_ptr.vmem [resolvable:$true] %s127_s12 }
  0x29   :  { %149 = vmatprep.subr.bf16.mxu0 %v246_v0  ;;  %s214_s13 = scalar_lea.vmem %s128_s12, 64  ;;  %p219_p3 = scmp.lt.s32.totalorder %s128_s12, %s128_s12 }
  0x2a   :  { %p215_p2 = scmp.ne.s32.totalorder %s128_s12, %s214_s13  ;;  %p220_p4 = scmp.lt.s32.totalorder %s214_s13, %s214_s13 }
  0x2c   :  { %150 = vmatpush3.bf16.msra.mxu0 %v167_v2  ;;  %p221_p5 = por %p220_p4, %p219_p3 }
  0x2d   :  { %151 = vmatprep.subr.bf16.mxu0 %v246_v0 }
  0x2e   :  { %p222_p6 = pnand %p221_p5, %p215_p2 }
  0x30   :  { %152 = vmatpush3.bf16.msra.mxu0 %v168_v3 }
  0x31   :  { %153 = vmatprep.subr.bf16.mxu0 %v246_v0 }
  0x34   :  { %154 = vmatpush3.bf16.msra.mxu0 %v169_v4 }
  0x37   :  { %156 = vmatmul.mubr.msk.bf16.vlgmr.msra.gmra.mrb[0].mxu0 %vm76_vm1, %v42_v5 }
 0x10a   :  { %v114_v7 = vpop.f32.mrb[0].mxu0 }
 0x10b   :  { %v115_v8 = vadd.f32 %v114_v7, %v51_v6  ;;  %v157_v9 = vpop.f32.mrb[1].mxu0 }
 0x10c   :  { %v117_v10 = vpop.f32.mrb[2].mxu0 }
 0x10d   :  { %120 = vst [vmem:[#allocation7] sm:$0xf] %v115_v8  ;;  %v158_v11 = vpop.f32.mrb[3].mxu0 }
 0x10e   :  { %225 = shalt.err (!%p222_p6)
}
 0x10f   :  { %s226_s2 = scalar_lea.hbm %s318_s3, 64 }
 0x110   :  { %p227_p7 = scmp.ne.s32.totalorder %s318_s3, %s226_s2  ;;  %p230_p8 = scmp.lt.u32.totalorder %s226_s2, %s318_s3 }
 0x112   :  { %p232_p9 = pnand %p230_p8, %p227_p7 }
 0x114   :  { %235 = shalt.err (!%p232_p9)
}
 0x115   :  { %130 = dma.vmem_to_hbm [thread:$0]  %s128_s12, 64, %s318_s3, [#allocation4]  }
 0x116   :  { %240 = dma.done.wait [#allocation4], 64  }
 0x117   :  { %241 = vsyncadd [#allocation4], 4294967232 }
 0x118   :  { %134 = vsyncpa [#allocation3], 1 }
 0x119   :  { %135 = vsyncpa [#allocation6], 1 }
 0x11a   :  { %136 = vsyncpa [#allocation4], 1 }

// kernel: tpu_custom_call.1
= control target key start
LH: loop header
LB: loop body
LE: loop exit
PB: predicated region body
PF: predicated region fallthrough
CT: control target
= control target key end

     0   :  { %8 = vsyncpa [#allocation3], 0  ;;  %s315_s0 = inlined_call_operand.hbm [shape: bf16[4,64], index: 0, kind: input, shape index: {}]   ;;  %s316_s1 = inlined_call_operand.hbm [shape: bf16[64,128], index: 1, kind: input, shape index: {}]   ;;  %s317_s2 = inlined_call_operand.vmem [shape: f32[4,128], index: 2, kind: input, shape index: {}]   ;;  %s318_s3 = inlined_call_operand.hbm [shape: f32[4,128], index: 3, kind: output, shape index: {}]  }
   0x1   :  { %9 = vsyncpa [#allocation6], 0 }
   0x2   :  { %10 = vsyncpa [#allocation4], 0  ;;  %s242_s12 = smov [#allocation2]   ;;  %s243_s14 = smov [#allocation5]  }
   0x3   :  { %s17_s13 = sshll.u32 %s242_s12, 4  ;;  %s26_s15 = sshll.u32 %s243_s14, 4  ;;  %s18_s13 = int_to_ptr.vmem [resolvable:$true] %s17_s13  ;;  %s269_s15 = int_to_ptr.vmem [resolvable:$true] %s26_s15 }
   0x4   :  { %s170_s18 = scalar_lea.hbm %s315_s0, 32 }
   0x5   :  { %p171_p0 = scmp.ne.s32.totalorder %s315_s0, %s170_s18  ;;  %p174_p1 = scmp.lt.u32.totalorder %s170_s18, %s315_s0 }
   0x7   :  { %p176_p2 = pnand %p174_p1, %p171_p0 }
   0x9   :  { %179 = shalt.err (!%p176_p2)
}
   0xa   :  { %s180_s23 = scalar_lea.vmem %s18_s13, 32  ;;  %p185_p4 = scmp.lt.s32.totalorder %s18_s13, %s18_s13 }
   0xb   :  { %p181_p3 = scmp.ne.s32.totalorder %s18_s13, %s180_s23  ;;  %p186_p5 = scmp.lt.s32.totalorder %s180_s23, %s180_s23 }
   0xd   :  { %p187_p6 = por %p186_p5, %p185_p4 }
   0xf   :  { %p188_p7 = pnand %p187_p6, %p181_p3 }
  0x11   :  { %191 = shalt.err (!%p188_p7)
}
  0x12   :  { %20 = dma.hbm_to_vmem [thread:$0]  %s315_s0, 32, %s18_s13, [#allocation3]  }
  0x13   :  { %s192_s28 = scalar_lea.hbm %s316_s1, 512 }
  0x14   :  { %p193_p8 = scmp.ne.s32.totalorder %s316_s1, %s192_s28  ;;  %p196_p9 = scmp.lt.u32.totalorder %s192_s28, %s316_s1 }
  0x16   :  { %p198_p10 = pnand %p196_p9, %p193_p8 }
  0x18   :  { %201 = shalt.err (!%p198_p10)
}
  0x19   :  { %s202_s6 = scalar_lea.vmem %s269_s15, 512  ;;  %p207_p12 = scmp.lt.s32.totalorder %s269_s15, %s269_s15 }
  0x1a   :  { %p203_p11 = scmp.ne.s32.totalorder %s269_s15, %s202_s6  ;;  %p208_p13 = scmp.lt.s32.totalorder %s202_s6, %s202_s6 }
  0x1c   :  { %p209_p0 = por %p208_p13, %p207_p12 }
  0x1e   :  { %p210_p1 = pnand %p209_p0, %p203_p11 }
  0x20   :  { %213 = shalt.err (!%p210_p1)
}
  0x21   :  { %s244_s0 = smov 64   ;;  %s245_s7 = smov 4  }
  0x22   :  { %32 = dma.hbm_to_vmem [thread:$0]  %s316_s1, 512, %s269_s15, [#allocation6], %s244_s0, %s244_s0, %s245_s7  }
  0x23   :  { %236 = dma.done.wait [#allocation3], 32  }
  0x24   :  { %237 = vsyncadd [#allocation3], 4294967264 }
  0x25   :  { %238 = dma.done.wait [#allocation6], 512  }
  0x26   :  { %239 = vsyncadd [#allocation6], 4294966784  ;;  %v246_v0 = vmov 0.0   ;;  %vm247_vm0 = vmmov 0   ;;  %v166_v1 = vld [vmem:[#allocation5] sm:$0xff]   ;;  %v167_v2 = vld [vmem:[#allocation5 + $0x8] sm:$0xff]  }
  0x27   :  { %147 = vmatprep.subr.bf16.mxu0 %v246_v0  ;;  %155 = vmatprep.mubr.msk.bf16.mxu0 %vm247_vm0, %v246_v0  ;;  %v168_v3 = vld [vmem:[#allocation5 + $0x10] sm:$0xff]   ;;  %v169_v4 = vld [vmem:[#allocation5 + $0x18] sm:$0xff]   ;;  %vm76_vm1 = vcmask 523264   ;;  %s248_s11 = smov [#allocation7]  }
  0x28   :  { %148 = vmatpush3.bf16.msra.mxu0 %v166_v1  ;;  %v42_v5 = vld [vmem:[#allocation2] sm:$0x3]  ;;  %v51_v6 = vld [vmem:[%s317_s2] sm:$0xf]  ;;  %s127_s12 = sshll.u32 %s248_s11, 4  ;;  %s128_s12 = int_to_ptr.vmem [resolvable:$true] %s127_s12 }
  0x29   :  { %149 = vmatprep.subr.bf16.mxu0 %v246_v0  ;;  %s214_s13 = scalar_lea.vmem %s128_s12, 64  ;;  %p219_p3 = scmp.lt.s32.totalorder %s128_s12, %s128_s12 }
  0x2a   :  { %p215_p2 = scmp.ne.s32.totalorder %s128_s12, %s214_s13  ;;  %p220_p4 = scmp.lt.s32.totalorder %s214_s13, %s214_s13 }
  0x2c   :  { %150 = vmatpush3.bf16.msra.mxu0 %v167_v2  ;;  %p221_p5 = por %p220_p4, %p219_p3 }
  0x2d   :  { %151 = vmatprep.subr.bf16.mxu0 %v246_v0 }
  0x2e   :  { %p222_p6 = pnand %p221_p5, %p215_p2 }
  0x30   :  { %152 = vmatpush3.bf16.msra.mxu0 %v168_v3 }
  0x31   :  { %153 = vmatprep.subr.bf16.mxu0 %v246_v0 }
  0x34   :  { %154 = vmatpush3.bf16.msra.mxu0 %v169_v4 }
  0x37   :  { %156 = vmatmul.mubr.msk.bf16.vlgmr.msra.gmra.mrb[0].mxu0 %vm76_vm1, %v42_v5 }
 0x10a   :  { %v114_v7 = vpop.f32.mrb[0].mxu0 }
 0x10b   :  { %v115_v8 = vadd.f32 %v114_v7, %v51_v6  ;;  %v157_v9 = vpop.f32.mrb[1].mxu0 }
 0x10c   :  { %v117_v10 = vpop.f32.mrb[2].mxu0 }
 0x10d   :  { %120 = vst [vmem:[#allocation7] sm:$0xf] %v115_v8  ;;  %v158_v11 = vpop.f32.mrb[3].mxu0 }
 0x10e   :  { %225 = shalt.err (!%p222_p6)
}
 0x10f   :  { %s226_s2 = scalar_lea.hbm %s318_s3, 64 }
 0x110   :  { %p227_p7 = scmp.ne.s32.totalorder %s318_s3, %s226_s2  ;;  %p230_p8 = scmp.lt.u32.totalorder %s226_s2, %s318_s3 }
 0x112   :  { %p232_p9 = pnand %p230_p8, %p227_p7 }
 0x114   :  { %235 = shalt.err (!%p232_p9)
}
 0x115   :  { %130 = dma.vmem_to_hbm [thread:$0]  %s128_s12, 64, %s318_s3, [#allocation4]  }
 0x116   :  { %240 = dma.done.wait [#allocation4], 64  }
 0x117   :  { %241 = vsyncadd [#allocation4], 4294967232 }
 0x118   :  { %134 = vsyncpa [#allocation3], 1 }
 0x119   :  { %135 = vsyncpa [#allocation6], 1 }
 0x11a   :  { %136 = vsyncpa [#allocation4], 1 }

</bundles_post_ra>
